<compile_context>
chip_gen: v6e
topology: v6e:2x2x1
jax: 0.10.0
libtpu: 0.0.40
codegen_flags: <defaults>
</compile_context>

<pallas_src>
import math

import jax
import jax.numpy as jnp
from jax.experimental import pallas as pl
from jax.experimental.pallas import tpu as pltpu


# ----------------------------------------------------------------------------
# Kernel body
# ----------------------------------------------------------------------------
def _make_hermite_kernel(degree: int, eps: float, input_dim: int,
                         use_slab: bool):
    """Kernel with degree / eps / input_dim / slab-mode baked in statically."""
    scale = math.sqrt(2.0 * degree + 1.0) + eps
    pi_qrt = math.pi ** (-0.25)
    sqrt2 = math.sqrt(2.0)
    I = input_dim

    def _build(x, emit):
        # x: (I, bm) f32 — batch on the 128-lane axis, every vreg is dense.
        x = jnp.tanh(x) * scale
        gauss = jnp.exp(-0.5 * x * x)
        h_m2 = pi_qrt * gauss                       # H_0
        emit(0, h_m2)
        if degree > 0:
            h_m1 = (sqrt2 * pi_qrt) * x * gauss     # H_1
            emit(1, h_m1)
            # H_i = sqrt(2/i) * x * H_{i-1} - sqrt((i-1)/i) * H_{i-2}
            for i in range(2, degree + 1):
                h = (math.sqrt(2.0 / i) * x * h_m1
                     - math.sqrt((i - 1.0) / i) * h_m2)
                emit(i, h)
                h_m2, h_m1 = h_m1, h

    if use_slab:
        # Large K: stream each finished degree into a (K, bm) VMEM slab.
        # Stores are full-lane, sublane-offset-only (aligned when I % 8 == 0).
        def kernel(x_ref, coeff_ref, out_ref, slab_ref):
            def emit(d, h):
                slab_ref[d * I:(d + 1) * I, :] = h
            _build(x_ref[...].astype(jnp.float32), emit)
            out_ref[...] = jnp.dot(
                coeff_ref[...], slab_ref[...],
                preferred_element_type=jnp.float32).astype(out_ref.dtype)
    else:
        # Small K: keep all Hermite features in registers and feed the MXU
        # directly (no VMEM round-trip).
        def kernel(x_ref, coeff_ref, out_ref):
            feats = [None] * (degree + 1)

            def emit(d, h):
                feats[d] = h
            _build(x_ref[...].astype(jnp.float32), emit)
            slab = feats[0] if degree == 0 else jnp.concatenate(feats, axis=0)
            out_ref[...] = jnp.dot(
                coeff_ref[...], slab,
                preferred_element_type=jnp.float32).astype(out_ref.dtype)

    return kernel


# ----------------------------------------------------------------------------
# Parameter prep (done once, not per forward call)
# ----------------------------------------------------------------------------
def prepare_hermite_coeffs(hermite_coeffs, sublane: int = 8):
    """(I, O, D+1) torch layout -> (O_pad, K) packed f32, K = (D+1)*I.

    Column index of the packed matrix is d*I + i, matching the feature slab
    built by the kernel (packed[o, d*I + i] = coeffs[i, o, d]).  With the
    batch-on-lanes layout the output dim sits on sublanes, so O only needs
    zero-padding to a multiple of 8.
    """
    input_dim, output_dim, dp1 = hermite_coeffs.shape
    k = dp1 * input_dim
    packed = jnp.transpose(hermite_coeffs, (1, 2, 0)).reshape(output_dim, k)
    packed = packed.astype(jnp.float32)
    o_pad = pl.cdiv(output_dim, sublane) * sublane
    if o_pad != output_dim:
        packed = jnp.pad(packed, ((0, o_pad - output_dim), (0, 0)))
    return packed


# ----------------------------------------------------------------------------
# Chip-aware sizing helpers
# ----------------------------------------------------------------------------
# Keep Hermite features in registers while they fit ~32 f32 vregs.
_REG_FEATURE_BYTES = 128 * 1024


def _tpu_vmem_capacity_bytes() -> int:
    try:
        return int(pltpu.get_tpu_info().vmem_capacity_bytes)
    except Exception:
        return 64 << 20          # conservative fallback (v7x per-TC VMEM)


def _num_tensorcores() -> int:
    try:
        kind = jax.devices()[0].device_kind.lower()
    except Exception:
        return 1
    return 2 if ("v7" in kind or "7x" in kind) else 1


def _vmem_need(bm, input_dim, k, o_pad, x_itemsize, use_slab):
    need = (2 * input_dim * bm * x_itemsize   # x tiles (double-buffered)
            + k * o_pad * 4                   # coeffs (whole array, 1 buffer)
            + 2 * o_pad * bm * 4)             # out tiles (double-buffered)
    if use_slab:
        need += k * bm * 4                    # feature slab scratch
    return need


def _pick_block_b(b128: int, block_b: int, two_cores: bool) -> int:
    """Batch tile: multiple of 128 (lane axis).  On 2-TC chips (v7x) prefer
    >= 2 grid steps so both TensorCores get work, but never below 256 rows."""
    bm = min(block_b, b128)
    if two_cores and b128 >= 512:
        half = pl.cdiv(pl.cdiv(b128, 2), 128) * 128
        bm = min(bm, max(256, half))
    bm = max(128, (bm // 128) * 128)
    return bm


# ----------------------------------------------------------------------------
# Forward wrapper
# ----------------------------------------------------------------------------
def hermite_kan_linear(x, packed_coeffs, *, input_dim: int, output_dim: int,
                       degree: int, eps: float = 1.0, block_b: int = 512):
    """Pallas implementation of HermiteFuncKANLinear.forward.

    x:             any shape whose element count is divisible by input_dim
    packed_coeffs: output of prepare_hermite_coeffs(), (O_pad, (D+1)*I) f32
    returns:       (B, output_dim) float32, B = x.size // input_dim
    """
    o_pad, K = packed_coeffs.shape
    assert K == (degree + 1) * input_dim
    assert o_pad >= output_dim and o_pad % 8 == 0

    # Batch on the lane axis: transpose once in the wrapper.
    x2d = jnp.reshape(x, (-1, input_dim))
    B = x2d.shape[0]
    x_t = jnp.transpose(x2d)                                   # (I, B)

    two_cores = _num_tensorcores() >= 2
    budget = int(0.85 * _tpu_vmem_capacity_bytes())

    b128 = pl.cdiv(B, 128) * 128
    bm = _pick_block_b(b128, block_b, two_cores)
    itemsize = jnp.dtype(x_t.dtype).itemsize
    use_slab = K * bm * 4 > _REG_FEATURE_BYTES
    # Shrink the batch tile if it would not fit the per-core VMEM budget.
    while bm > 128 and _vmem_need(bm, input_dim, K, o_pad,
                                  itemsize, use_slab) > budget:
        bm = max(128, pl.cdiv(bm // 2, 128) * 128)
        use_slab = K * bm * 4 > _REG_FEATURE_BYTES

    n_tiles = pl.cdiv(B, bm)
    b_pad = n_tiles * bm
    if b_pad != B:
        x_t = jnp.pad(x_t, ((0, 0), (0, b_pad - B)))

    kernel = _make_hermite_kernel(degree, eps, input_dim, use_slab)

    need = _vmem_need(bm, input_dim, K, o_pad, itemsize, use_slab)
    vmem_limit = int(min(max(need + (4 << 20), 32 << 20), budget))

    cost = pl.CostEstimate(
        flops=int(2 * b_pad * K * o_pad
                  + 6 * b_pad * input_dim * (degree + 1)),
        transcendentals=int(2 * b_pad * input_dim),            # tanh + exp
        bytes_accessed=int(x_t.size * itemsize
                           + packed_coeffs.size * 4
                           + b_pad * o_pad * 4),
    )

    scratch = [pltpu.VMEM((K, bm), jnp.float32)] if use_slab else []

    out_t = pl.pallas_call(
        kernel,
        out_shape=jax.ShapeDtypeStruct((o_pad, b_pad), jnp.float32),
        grid_spec=pltpu.PrefetchScalarGridSpec(
            num_scalar_prefetch=0,
            grid=(n_tiles,),
            in_specs=[
                pl.BlockSpec((input_dim, bm), lambda i: (0, i)),
                # Coefficients never change across the grid: keep the whole
                # array resident in VMEM, single-buffered (no double-buffer).
                pl.BlockSpec(memory_space=pltpu.MemorySpace.VMEM),
            ],
            out_specs=pl.BlockSpec((o_pad, bm), lambda i: (0, i)),
            scratch_shapes=scratch,
        ),
        compiler_params=pltpu.CompilerParams(
            dimension_semantics=("parallel",),
            vmem_limit_bytes=vmem_limit),
        cost_estimate=cost,
    )(x_t, packed_coeffs)

    # (O_pad, B_pad) -> (B, O): strip padding, put batch back on the lead axis.
    return jnp.transpose(out_t[:output_dim, :B])


# ----------------------------------------------------------------------------
# Pure-JAX reference (mirrors the torch code) for correctness checking
# ----------------------------------------------------------------------------
def _reference(x, coeffs, degree, eps):
    input_dim = coeffs.shape[0]
    x = jnp.reshape(x, (-1, input_dim)).astype(jnp.float32)
    x = jnp.tanh(x) * (math.sqrt(2 * degree + 1) + eps)
    cols = [(math.pi ** (-0.25)) * jnp.exp(-x ** 2 / 2)]
    if degree > 0:
        cols.append(math.sqrt(2.0) * (math.pi ** (-0.25)) * x
                    * jnp.exp(-x ** 2 / 2))
    for i in range(2, degree + 1):
        cols.append(math.sqrt(2.0 / i) * x * cols[i - 1]
                    - math.sqrt((i - 1.0) / i) * cols[i - 2])
    hermite = jnp.stack(cols, axis=-1)  # (B, I, D+1)
    return jnp.einsum('bid,iod->bo', hermite, coeffs.astype(jnp.float32))


if __name__ == "__main__":
    # Module hyper-parameters (small shapes consistent with the forward).
    input_dim = 16
    output_dim = 32
    degree = 5
    eps = 1.0

    key = jax.random.PRNGKey(0)
    kx, kw = jax.random.split(key)

    # Example input: (2, 4, 16, 16) -> reshaped to (128, 16) inside forward.
    x = jax.random.normal(kx, (2, 4, 16, 16), dtype=jnp.float32)

    # Parameter init matching nn.init.normal_(mean=0, std=1/(I*(D+1))).
    std = 1.0 / (input_dim * (degree + 1))
    hermite_coeffs = std * jax.random.normal(
        kw, (input_dim, output_dim, degree + 1), dtype=jnp.float32)

    # Parameter-prep (done once, outside the per-call forward path).
    packed = prepare_hermite_coeffs(hermite_coeffs)

    y = hermite_kan_linear(x, packed, input_dim=input_dim,
                           output_dim=output_dim, degree=degree, eps=eps)
    y = jax.block_until_ready(y)

    y_ref = _reference(x, hermite_coeffs, degree, eps)
    assert y.shape == (128, output_dim)
    assert jnp.allclose(y, y_ref, atol=1e-5, rtol=1e-5), "mismatch vs reference"

    print("KERNEL_OK")
</pallas_src>

<mosaic_0001>
module attributes {stable_mosaic.version = 11 : i64} {
  func.func @kernel(%arg0: i32, %arg1: memref<16x128xf32, #tpu.memory_space<vmem>>, %arg2: memref<32x96xf32, #tpu.memory_space<vmem>>, %arg3: memref<32x128xf32, #tpu.memory_space<vmem>>) attributes {dimension_semantics = [#tpu.dimension_semantics<parallel>], iteration_bounds = array<i64: 1>, scalar_prefetch = 0 : i64, scratch_operands = 0 : i64, tpu.core_type = #tpu.core_type<tc>, window_params = [{transform_indices = @transform_0, window_bounds = array<i64: 16, 128>}, {pipeline_mode = #tpu.pipeline_mode<synchronous>, transform_indices = @transform_1, window_bounds = array<i64: 32, 96>}, {transform_indices = @transform_2, window_bounds = array<i64: 32, 128>}]} {
    %c0 = arith.constant 0 : index
    %c0_0 = arith.constant 0 : index
    %0 = vector.load %arg1[%c0, %c0_0] : memref<16x128xf32, #tpu.memory_space<vmem>>, vector<16x128xf32>
    %1 = math.tanh %0 : vector<16x128xf32>
    %cst = arith.constant 4.31662464 : f32
    %2 = vector.broadcast %cst : f32 to vector<16x128xf32>
    %3 = arith.mulf %1, %2 : vector<16x128xf32>
    %cst_1 = arith.constant -5.000000e-01 : f32
    %4 = vector.broadcast %cst_1 : f32 to vector<16x128xf32>
    %5 = arith.mulf %4, %3 : vector<16x128xf32>
    %6 = arith.mulf %5, %3 : vector<16x128xf32>
    %7 = math.exp %6 : vector<16x128xf32>
    %cst_2 = arith.constant 0.751125574 : f32
    %8 = vector.broadcast %cst_2 : f32 to vector<16x128xf32>
    %9 = arith.mulf %8, %7 : vector<16x128xf32>
    %cst_3 = arith.constant 1.06225193 : f32
    %10 = vector.broadcast %cst_3 : f32 to vector<16x128xf32>
    %11 = arith.mulf %10, %3 : vector<16x128xf32>
    %12 = arith.mulf %11, %7 : vector<16x128xf32>
    %cst_4 = arith.constant 1.000000e+00 : f32
    %13 = vector.broadcast %cst_4 : f32 to vector<16x128xf32>
    %14 = arith.mulf %13, %3 : vector<16x128xf32>
    %15 = arith.mulf %14, %12 : vector<16x128xf32>
    %cst_5 = arith.constant 0.707106769 : f32
    %16 = vector.broadcast %cst_5 : f32 to vector<16x128xf32>
    %17 = arith.mulf %16, %9 : vector<16x128xf32>
    %18 = arith.subf %15, %17 : vector<16x128xf32>
    %cst_6 = arith.constant 0.816496611 : f32
    %19 = vector.broadcast %cst_6 : f32 to vector<16x128xf32>
    %20 = arith.mulf %19, %3 : vector<16x128xf32>
    %21 = arith.mulf %20, %18 : vector<16x128xf32>
    %cst_7 = arith.constant 0.816496611 : f32
    %22 = vector.broadcast %cst_7 : f32 to vector<16x128xf32>
    %23 = arith.mulf %22, %12 : vector<16x128xf32>
    %24 = arith.subf %21, %23 : vector<16x128xf32>
    %cst_8 = arith.constant 0.707106769 : f32
    %25 = vector.broadcast %cst_8 : f32 to vector<16x128xf32>
    %26 = arith.mulf %25, %3 : vector<16x128xf32>
    %27 = arith.mulf %26, %24 : vector<16x128xf32>
    %cst_9 = arith.constant 0.866025388 : f32
    %28 = vector.broadcast %cst_9 : f32 to vector<16x128xf32>
    %29 = arith.mulf %28, %18 : vector<16x128xf32>
    %30 = arith.subf %27, %29 : vector<16x128xf32>
    %cst_10 = arith.constant 0.632455527 : f32
    %31 = vector.broadcast %cst_10 : f32 to vector<16x128xf32>
    %32 = arith.mulf %31, %3 : vector<16x128xf32>
    %33 = arith.mulf %32, %30 : vector<16x128xf32>
    %cst_11 = arith.constant 0.89442718 : f32
    %34 = vector.broadcast %cst_11 : f32 to vector<16x128xf32>
    %35 = arith.mulf %34, %24 : vector<16x128xf32>
    %36 = arith.subf %33, %35 : vector<16x128xf32>
    %37 = tpu.concatenate %9, %12, %18, %24, %30, %36 in 0 : vector<16x128xf32>, vector<16x128xf32>, vector<16x128xf32>, vector<16x128xf32>, vector<16x128xf32>, vector<16x128xf32> -> vector<96x128xf32>
    %c0_12 = arith.constant 0 : index
    %c0_13 = arith.constant 0 : index
    %38 = vector.load %arg2[%c0_12, %c0_13] : memref<32x96xf32, #tpu.memory_space<vmem>>, vector<32x96xf32>
    %cst_14 = arith.constant dense<0.000000e+00> : vector<32x128xf32>
    %39 = tpu.matmul %38, %37, %cst_14 {dimension_numbers = #tpu.dot_dimension_numbers<[1], [0], [0], [1], [0, 0, 1, 1], [], []>} : vector<32x96xf32>, vector<96x128xf32>, vector<32x128xf32> -> vector<32x128xf32>
    %c0_15 = arith.constant 0 : index
    %c0_16 = arith.constant 0 : index
    %40 = vector.load %arg3[%c0_15, %c0_16] : memref<32x128xf32, #tpu.memory_space<vmem>>, vector<32x128xf32>
    tpu.vector_store %arg3[%c0_15, %c0_16], %39 {strides = array<i32>} : memref<32x128xf32, #tpu.memory_space<vmem>>, vector<32x128xf32>,
    return
  }
  func.func @transform_0(%arg0: i32) -> (i32, i32) {
    %c0_i32 = arith.constant 0 : i32
    %c0_i32_0 = arith.constant 0 : i32
    return %c0_i32, %arg0 : i32, i32
  }
  func.func @transform_1(%arg0: i32) -> (i32, i32) {
    %c0_i32 = arith.constant 0 : i32
    %c0_i32_0 = arith.constant 0 : i32
    %c0_i32_1 = arith.constant 0 : i32
    return %c0_i32, %c0_i32_0 : i32, i32
  }
  func.func @transform_2(%arg0: i32) -> (i32, i32) {
    %c0_i32 = arith.constant 0 : i32
    %c0_i32_0 = arith.constant 0 : i32
    return %c0_i32, %arg0 : i32, i32
  }
}

</mosaic_0001>

<bundles_post_ra>
// kernel: tpu_custom_call.1
= control target key start
LH: loop header
LB: loop body
LE: loop exit
PB: predicated region body
PF: predicated region fallthrough
CT: control target
= control target key end

     0   :  { %7 = vsyncpa [#allocation3], 0  ;;  %s439_s0 = inlined_call_operand.hbm [shape: f32[16,128], index: 0, kind: input, shape index: {}]   ;;  %s440_s1 = inlined_call_operand.hbm [shape: f32[32,96], index: 1, kind: input, shape index: {}]   ;;  %s441_s2 = inlined_call_operand.hbm [shape: f32[32,128], index: 2, kind: output, shape index: {}]  }
   0x1   :  { %8 = vsyncpa [#allocation6], 0 }
   0x2   :  { %9 = vsyncpa [#allocation4], 0  ;;  %s367_s9 = smov [#allocation2]  }
   0x3   :  { %s15_s10 = sshll.u32 %s367_s9, 4  ;;  %s16_s10 = int_to_ptr.vmem [resolvable:$true] %s15_s10 }
   0x4   :  { %s309_s11 = scalar_lea.vmem %s16_s10, 256  ;;  %p314_p1 = scmp.lt.s32.totalorder %s16_s10, %s16_s10 }
   0x5   :  { %p310_p0 = scmp.ne.s32.totalorder %s16_s10, %s309_s11  ;;  %p315_p2 = scmp.lt.s32.totalorder %s309_s11, %s309_s11 }
   0x7   :  { %p316_p3 = por %p315_p2, %p314_p1 }
   0x9   :  { %p317_p4 = pnand %p316_p3, %p310_p0 }
   0xb   :  { %320 = shalt.err (!%p317_p4)
}
   0xc   :  { %s368_s12 = smov 128   ;;  %s369_s13 = smov 8  }
   0xd   :  { %21 = dma.hbm_to_vmem [thread:$0]  %s439_s0, 256, %s16_s10, [#allocation3], %s368_s12, %s368_s12, %s369_s13  }
   0xe   :  { %s370_s16 = smov [#allocation5]  }
   0xf   :  { %s27_s17 = sshll.u32 %s370_s16, 4  ;;  %s28_s17 = int_to_ptr.vmem [resolvable:$true] %s27_s17 }
  0x10   :  { %s329_s18 = scalar_lea.vmem %s28_s17, 512  ;;  %p334_p6 = scmp.lt.s32.totalorder %s28_s17, %s28_s17 }
  0x11   :  { %p330_p5 = scmp.ne.s32.totalorder %s28_s17, %s329_s18  ;;  %p335_p7 = scmp.lt.s32.totalorder %s329_s18, %s329_s18 }
  0x13   :  { %p336_p8 = por %p335_p7, %p334_p6 }
  0x15   :  { %p337_p9 = pnand %p336_p8, %p330_p5 }
  0x17   :  { %340 = shalt.err (!%p337_p9)
}
  0x18   :  { %33 = dma.hbm_to_vmem [thread:$0]  %s440_s1, 512, %s28_s17, [#allocation6], %s368_s12, %s368_s12, %s369_s13  }
  0x19   :  { %361 = dma.done.wait [#allocation3], 256  }
  0x1a   :  { %362 = vsyncadd [#allocation3], 4294967040 }
  0x1b   :  { %363 = dma.done.wait [#allocation6], 512  }
  0x1c   :  { %364 = vsyncadd [#allocation6], 4294966784  ;;  %vm94_vm0 = vcmask 785408   ;;  %v41_v0 = vld [vmem:[#allocation2 + $0x8] sm:$0xff]  ;;  %v40_v1 = vld [vmem:[#allocation2] sm:$0xff]  ;;  %s371_s0 = smov [#allocation7]  }
  0x1d   :  { %v90_v2 = vld [vmem:[#allocation5] sm:$0xff]  ;;  %293 = vtanh.f32 %v41_v0  ;;  %v92_v3 = vld [vmem:[#allocation5 + $0x10] sm:$0xff]  ;;  %v91_v52 = vld [vmem:[#allocation5 + $0x8] sm:$0xff]  ;;  %s201_s1 = sshll.u32 %s371_s0, 4  ;;  %s202_s1 = int_to_ptr.vmem [resolvable:$true] %s201_s1 }
  0x1e   :  { %258 = vmatprep.mubr.msk.f32.mxu0 %vm94_vm0, %v90_v2  ;;  %295 = vtanh.f32 %v40_v1  ;;  %261 = vmatprep.mubr.msk.f32.mxu1 %vm94_vm0, %v92_v3  ;;  %v93_v53 = vld [vmem:[#allocation5 + $0x18] sm:$0xff]  ;;  %s341_s21 = scalar_lea.vmem %s202_s1, 512  ;;  %p346_p11 = scmp.lt.s32.totalorder %s202_s1, %s202_s1 }
  0x1f   :  { %p342_p10 = scmp.ne.s32.totalorder %s202_s1, %s341_s21  ;;  %p347_p12 = scmp.lt.s32.totalorder %s341_s21, %s341_s21 }
  0x21   :  { %p348_p13 = por %p347_p12, %p346_p11 }
  0x23   :  { %p349_p0 = pnand %p348_p13, %p342_p10 }
  0x2a   :  { %v294_v4 = vpop.eup %293 }
  0x2b   :  { %v296_v5 = vpop.eup %295  ;;  %v45_v6 = vmul.f32 4.3166246, %v294_v4 }
  0x2c   :  { %v44_v7 = vmul.f32 4.3166246, %v296_v5 }
  0x2d   :  { %v47_v8 = vmul.f32 -0.5, %v45_v6  ;;  %v57_v14 = vmul.f32 1.0622519, %v45_v6  ;;  %v67_v24 = vmul.f32 0.8164966, %v45_v6 }
  0x2e   :  { %v46_v9 = vmul.f32 -0.5, %v44_v7  ;;  %v56_v15 = vmul.f32 1.0622519, %v44_v7  ;;  %v66_v27 = vmul.f32 0.8164966, %v44_v7 }
  0x2f   :  { %v49_v10 = vmul.f32 %v47_v8, %v45_v6  ;;  %v75_v33 = vmul.f32 0.70710677, %v45_v6  ;;  %v74_v35 = vmul.f32 0.70710677, %v44_v7  ;;  %v83_v41 = vmul.f32 0.6324555, %v45_v6 }
  0x30   :  { %v48_v11 = vmul.f32 %v46_v9, %v44_v7  ;;  %v82_v43 = vmul.f32 0.6324555, %v44_v7 }
  0x31   :  { %v52_v12 = vmul.f32 1.442695, %v49_v10 }
  0x32   :  { %v50_v13 = vmul.f32 1.442695, %v48_v11 }
  0x33   :  { %297 = vpow2.f32 %v52_v12 }
  0x34   :  { %299 = vpow2.f32 %v50_v13 }
  0x40   :  { %v298_v16 = vpop.eup %297 }
  0x41   :  { %v300_v17 = vpop.eup %299  ;;  %v401_v18 = vmul.f32 0.7511256, %v298_v16  ;;  %v403_v19 = vmul.f32 %v298_v16, %v57_v14 }
  0x42   :  { %v405_v20 = vmul.f32 0.7511256, %v300_v17  ;;  %v407_v21 = vmul.f32 %v300_v17, %v56_v15 }
  0x43   :  { %v61_v22 = vmul.f32 %v403_v19, %v45_v6  ;;  %v63_v23 = vmul.f32 0.70710677, %v401_v18  ;;  %v71_v29 = vmul.f32 0.8164966, %v403_v19 }
  0x44   :  { %v60_v25 = vmul.f32 %v407_v21, %v44_v7  ;;  %v62_v26 = vmul.f32 0.70710677, %v405_v20  ;;  %v70_v31 = vmul.f32 0.8164966, %v407_v21 }
  0x45   :  { %v65_v28 = vsub.f32 %v61_v22, %v63_v23 }
  0x46   :  { %v64_v30 = vsub.f32 %v60_v25, %v62_v26 }
  0x47   :  { %v69_v32 = vmul.f32 %v67_v24, %v65_v28  ;;  %v79_v37 = vmul.f32 0.8660254, %v65_v28 }
  0x48   :  { %v68_v34 = vmul.f32 %v66_v27, %v64_v30  ;;  %v78_v39 = vmul.f32 0.8660254, %v64_v30 }
  0x49   :  { %v73_v36 = vsub.f32 %v69_v32, %v71_v29 }
  0x4a   :  { %v72_v38 = vsub.f32 %v68_v34, %v70_v31 }
  0x4b   :  { %v77_v40 = vmul.f32 %v75_v33, %v73_v36  ;;  %v87_v45 = vmul.f32 0.8944272, %v73_v36 }
  0x4c   :  { %v76_v42 = vmul.f32 %v74_v35, %v72_v38  ;;  %v86_v47 = vmul.f32 0.8944272, %v72_v38 }
  0x4d   :  { %v81_v44 = vsub.f32 %v77_v40, %v79_v37 }
  0x4e   :  { %v80_v46 = vsub.f32 %v76_v42, %v78_v39 }
  0x4f   :  { %v85_v48 = vmul.f32 %v83_v41, %v81_v44 }
  0x50   :  { %v84_v49 = vmul.f32 %v82_v43, %v80_v46 }
  0x51   :  { %v89_v50 = vsub.f32 %v85_v48, %v87_v45 }
  0x52   :  { %v88_v51 = vsub.f32 %v84_v49, %v86_v47 }
  0x53   :  { %234 = vmatprep.subr.mxu0 %v89_v50  ;;  %264 = vmatprep.subr.mxu1 %v89_v50 }
  0x54   :  { %235 = vmatpush3.msra.mxu0 %v89_v50  ;;  %276 = vmatpush3.msra.mxu1 %v89_v50 }
  0x55   :  { %236 = vmatprep.subr.mxu0 %v88_v51  ;;  %265 = vmatprep.subr.mxu1 %v88_v51 }
  0x56   :  { %237 = vmatpush3.msra.mxu0 %v88_v51  ;;  %277 = vmatpush3.msra.mxu1 %v88_v51 }
  0x57   :  { %238 = vmatprep.subr.mxu0 %v81_v44  ;;  %266 = vmatprep.subr.mxu1 %v81_v44 }
  0x58   :  { %239 = vmatpush3.msra.mxu0 %v81_v44  ;;  %278 = vmatpush3.msra.mxu1 %v81_v44 }
  0x59   :  { %240 = vmatprep.subr.mxu0 %v80_v46  ;;  %267 = vmatprep.subr.mxu1 %v80_v46 }
  0x5a   :  { %241 = vmatpush3.msra.mxu0 %v80_v46  ;;  %279 = vmatpush3.msra.mxu1 %v80_v46 }
  0x5b   :  { %242 = vmatprep.subr.mxu0 %v73_v36  ;;  %268 = vmatprep.subr.mxu1 %v73_v36 }
  0x5c   :  { %243 = vmatpush3.msra.mxu0 %v73_v36  ;;  %280 = vmatpush3.msra.mxu1 %v73_v36 }
  0x5d   :  { %244 = vmatprep.subr.mxu0 %v72_v38  ;;  %269 = vmatprep.subr.mxu1 %v72_v38 }
  0x5e   :  { %245 = vmatpush3.msra.mxu0 %v72_v38  ;;  %281 = vmatpush3.msra.mxu1 %v72_v38 }
  0x5f   :  { %246 = vmatprep.subr.mxu0 %v65_v28  ;;  %270 = vmatprep.subr.mxu1 %v65_v28 }
  0x60   :  { %247 = vmatpush3.msra.mxu0 %v65_v28  ;;  %282 = vmatpush3.msra.mxu1 %v65_v28 }
  0x61   :  { %248 = vmatprep.subr.mxu0 %v64_v30  ;;  %271 = vmatprep.subr.mxu1 %v64_v30 }
  0x62   :  { %249 = vmatpush3.msra.mxu0 %v64_v30  ;;  %283 = vmatpush3.msra.mxu1 %v64_v30 }
  0x63   :  { %250 = vmatprep.subr.mxu0 %v403_v19  ;;  %272 = vmatprep.subr.mxu1 %v403_v19 }
  0x64   :  { %251 = vmatpush3.msra.mxu0 %v403_v19  ;;  %284 = vmatpush3.msra.mxu1 %v403_v19 }
  0x65   :  { %252 = vmatprep.subr.mxu0 %v407_v21  ;;  %273 = vmatprep.subr.mxu1 %v407_v21 }
  0x66   :  { %253 = vmatpush3.msra.mxu0 %v407_v21  ;;  %285 = vmatpush3.msra.mxu1 %v407_v21 }
  0x67   :  { %254 = vmatprep.subr.mxu0 %v401_v18  ;;  %274 = vmatprep.subr.mxu1 %v401_v18 }
  0x68   :  { %255 = vmatpush3.msra.mxu0 %v401_v18  ;;  %286 = vmatpush3.msra.mxu1 %v401_v18 }
  0x69   :  { %256 = vmatprep.subr.mxu0 %v405_v20  ;;  %275 = vmatprep.subr.mxu1 %v405_v20 }
  0x6a   :  { %257 = vmatpush3.msra.mxu0 %v405_v20  ;;  %287 = vmatpush3.msra.mxu1 %v405_v20 }
  0x6b   :  { %259 = vmatmul.mubr.msk.f32.vlgmr.msra.gmra.mxu0 %vm94_vm0, %v91_v52  ;;  %262 = vmatmul.mubr.msk.f32.vlgmr.msra.gmra.mxu1 %vm94_vm0, %v93_v53 }
 0x12b   :  { %v260_v54 = vpop.f32.mrf.mxu0  ;;  %v263_v55 = vpop.f32.mrf.mxu1 }
 0x12c   :  { %193 = vst [vmem:[#allocation7 + $0x8] sm:$0xff] %v260_v54  ;;  %195 = vst [vmem:[#allocation7 + $0x18] sm:$0xff] %v263_v55 }
 0x12d   :  { %v173_v56 = vpop.f32.mrf.mxu0  ;;  %v183_v57 = vpop.f32.mrf.mxu1 }
 0x12e   :  { %192 = vst [vmem:[#allocation7] sm:$0xff] %v173_v56  ;;  %194 = vst [vmem:[#allocation7 + $0x10] sm:$0xff] %v183_v57 }
 0x12f   :  { %352 = shalt.err (!%p349_p0)
}
 0x130   :  { %207 = dma.vmem_to_hbm [thread:$0]  %s202_s1, 512, %s441_s2, [#allocation4], %s368_s12, %s368_s12, %s369_s13  }
 0x131   :  { %365 = dma.done.wait [#allocation4], 512  }
 0x132   :  { %366 = vsyncadd [#allocation4], 4294966784 }
 0x133   :  { %211 = vsyncpa [#allocation3], 1 }
 0x134   :  { %212 = vsyncpa [#allocation6], 1 }
 0x135   :  { %213 = vsyncpa [#allocation4], 1 }

</bundles_post_ra>
